<compile_context>
chip_gen: v7x
topology: tpu7x:2x2x1
jax: 0.10.0
libtpu: 0.0.40
codegen_flags: <defaults>
</compile_context>

<pallas_src>
import functools

import jax
import jax.numpy as jnp
from jax.experimental import pallas as pl
from jax.experimental.pallas import tpu as pltpu

_DEF_GAMMA = 2.0


def _round_up(x, m):
    return (x + m - 1) // m * m


def _device_kind():
    try:
        return jax.devices()[0].device_kind.lower()
    except Exception:
        return ""


def _num_tensorcores(kind):
    # 2 TensorCores per chip only on v7x; v5e/v6e are single-TC, where a
    # leading "parallel" axis would just be a serial loop with extra DMA.
    return 2 if ("v7" in kind or "7x" in kind) else 1


def _vmem_capacity_bytes():
    try:
        return int(pltpu.get_tpu_info().vmem_capacity_bytes)
    except Exception:
        return 64 << 20  # conservative fallback (v7x per-TC physical VMEM)


def _focal_loss_kernel(*refs, gamma, n_true, tile_n, tiles_per_core,
                       has_alpha, reduce_in_input_dtype):
    if has_alpha:
        alpha_ref, logits_ref, tgt_ref, out_ref = refs
    else:
        alpha_ref = None
        logits_ref, tgt_ref, out_ref = refs

    ci = pl.program_id(0)                    # TensorCore split ("parallel")
    ti = pl.program_id(1)                    # row-tile loop   ("arbitrary")

    @pl.when(ti == 0)
    def _init():
        out_ref[...] = jnp.zeros_like(out_ref)

    x_in = logits_ref[...]                   # (tile_n, C), input dtype
    t = tgt_ref[...]                         # (tile_n, 1) int32
    rows, ncls = x_in.shape

    # (1, C) class-index iota; broadcasting against t avoids a full-tile iota.
    cols = jax.lax.broadcasted_iota(jnp.int32, (1, ncls), 1)
    onehot = cols == t                       # (tile_n, C) bool via broadcast

    x = x_in.astype(jnp.float32)             # cast AFTER the (possibly bf16) load
    # max / target-gather are selections of existing values -> bit-exact in
    # the input dtype; do them in bf16 on bf16-native chips to halve VPU passes.
    xr = x_in if reduce_in_input_dtype else x
    m = jnp.max(xr, axis=-1, keepdims=True).astype(jnp.float32)
    tgt_logit = jnp.sum(jnp.where(onehot, xr, jnp.zeros((), xr.dtype)),
                        axis=-1, keepdims=True).astype(jnp.float32)

    # numerically stable log-sum-exp over classes (f32)
    lse = m + jnp.log(jnp.sum(jnp.exp(x - m), axis=-1, keepdims=True))

    ce = lse - tgt_logit                     # (tile_n, 1) = -log p_t  >= 0
    pt = jnp.exp(-ce)
    one_m_pt = jnp.maximum(1.0 - pt, 0.0)    # clamp consistently in all branches
    if gamma == 2.0:                         # static branch: square, not float pow
        mod = one_m_pt * one_m_pt
    elif gamma == 1.0:
        mod = one_m_pt
    elif gamma == 0.0:
        mod = jnp.ones_like(one_m_pt)
    else:
        mod = jnp.power(one_m_pt, gamma)
    focal = mod * ce                         # (tile_n, 1)

    if has_alpha:
        alpha_t = jnp.sum(jnp.where(onehot, alpha_ref[...], 0.0),
                          axis=-1, keepdims=True)
        focal = focal * alpha_t

    # Mask rows past the true batch size (ragged partial edge block, or the
    # clamped duplicate block of the 2-TC split).  MUST stay a select so
    # garbage/NaN in unpadded edge blocks cannot propagate.
    row0 = (ci * tiles_per_core + ti) * tile_n
    ridx = row0 + jax.lax.broadcasted_iota(jnp.int32, (rows, 1), 0)
    focal = jnp.where(ridx < n_true, focal, 0.0)

    # Per-step scalar partial (XLU reduce rides an otherwise-idle slot);
    # broadcast-add keeps the resident accumulator block lane-dense.
    out_ref[...] += jnp.sum(focal)


def focal_loss(logits, targets, *, alpha=None, gamma=_DEF_GAMMA,
               reduction="mean", tile_n=None):
    """logits: (N, C) float32/bfloat16, targets: (N,) int -> scalar float32."""
    if logits.ndim != 2:
        # F.cross_entropy layout (N, C, d1, ...): move classes last, flatten.
        c_ = logits.shape[1]
        logits = jnp.moveaxis(logits, 1, -1).reshape(-1, c_)
        targets = targets.reshape(-1)
    n, c = logits.shape

    kind = _device_kind()
    in_isz = jnp.dtype(logits.dtype).itemsize
    c_pad = _round_up(c, 128)                          # lane padding in VMEM

    # Generation-aware VMEM byte budget (v7x: 64 MiB/TC, v5e/v6e: 128 MiB).
    vmem_cap = _vmem_capacity_bytes()
    budget = min(vmem_cap // 4, 32 << 20)
    # per-row effective VMEM bytes: double-buffered (lane-padded) logits tile
    # + ~3 f32 full-tile temporaries + lane-padded per-row vectors
    # (targets x2, ce/pt/focal/iota ...).
    bytes_per_row = c_pad * (2 * in_isz + 3 * 4) + 8 * 128 * 4

    if tile_n is None:
        tile_n = budget // max(1, bytes_per_row)       # no artificial row cap
        tile_n = max(16, min(int(tile_n), 16384))
    tile_n = max(int(tile_n), 8)
    if tile_n >= n:
        tile_n = n                                     # full-rows block: always legal
    else:
        tile_n = _round_up(tile_n, 16)                 # sublane packing (bf16: 16)
    # TODO(synk): lane-pack k=128//C samples per vreg row for small C (segment
    # reductions over the lane dim); biggest relative win on v5e.

    total_tiles = pl.cdiv(n, tile_n)
    num_cores = max(1, min(_num_tensorcores(kind), total_tiles))
    tiles_per_core = pl.cdiv(total_tiles, num_cores)

    est_bytes = tile_n * bytes_per_row + (1 << 20)
    vmem_limit = int(max(32 << 20, min(vmem_cap - (8 << 20), 2 * est_bytes)))

    # No padding and no f32 upcast in the wrapper (bf16 streams at half bytes).
    tgt2d = targets.astype(jnp.int32).reshape(n, 1)

    has_alpha = alpha is not None
    operands, in_specs = [], []
    if has_alpha:
        alpha_arr = jnp.asarray(alpha, dtype=jnp.float32).reshape(1, c)
        operands.append(alpha_arr)
        in_specs.append(pl.BlockSpec((1, c), lambda ci, ti: (0, 0)))
    operands += [logits, tgt2d]

    last_blk = total_tiles - 1

    def _row_map(ci, ti):
        # Clamp so the (rare) overhang step of the 2-TC split stays in bounds;
        # its rows are discarded by the in-kernel `ridx < n` select.
        return (jnp.minimum(ci * tiles_per_core + ti, last_blk), 0)

    in_specs += [
        pl.BlockSpec((tile_n, c), _row_map),
        pl.BlockSpec((tile_n, 1), _row_map),
    ]

    reduce_in_input_dtype = (logits.dtype == jnp.bfloat16) and ("v5" not in kind)

    kernel = functools.partial(
        _focal_loss_kernel, gamma=float(gamma), n_true=n,
        tile_n=tile_n, tiles_per_core=tiles_per_core,
        has_alpha=has_alpha, reduce_in_input_dtype=reduce_in_input_dtype)

    partials = pl.pallas_call(
        kernel,
        out_shape=jax.ShapeDtypeStruct((num_cores * 8, 128), jnp.float32),
        grid_spec=pltpu.PrefetchScalarGridSpec(
            num_scalar_prefetch=0,
            grid=(num_cores, tiles_per_core),
            in_specs=in_specs,
            out_specs=pl.BlockSpec((8, 128), lambda ci, ti: (ci, 0)),
        ),
        compiler_params=pltpu.CompilerParams(
            dimension_semantics=("parallel", "arbitrary"),
            vmem_limit_bytes=vmem_limit),
    )(*operands)

    # Every element of a core's (8,128) block holds that core's partial sum.
    total = jnp.sum(partials[0::8, 0])
    if reduction == "mean":
        return total / jnp.float32(n)
    if reduction == "sum":
        return total
    raise NotImplementedError(
        "reduction='none' not implemented")  # TODO(synk): per-sample output path


def focal_loss_ref(logits, targets, gamma=_DEF_GAMMA, alpha=None):
    logits = logits.astype(jnp.float32)
    logp = jax.nn.log_softmax(logits, axis=-1)
    ce = -jnp.take_along_axis(logp, targets[:, None], axis=-1)[:, 0]
    pt = jnp.exp(-ce)
    focal = (1.0 - pt) ** gamma * ce
    if alpha is not None:
        focal = alpha[targets] * focal
    return jnp.mean(focal)


if __name__ == "__main__":
    key = jax.random.PRNGKey(0)
    k1, k2 = jax.random.split(key)
    N, C = 40, 16
    logits = jax.random.normal(k1, (N, C), dtype=jnp.float32)
    targets = jax.random.randint(k2, (N,), 0, C, dtype=jnp.int32)

    # small explicit tile -> multi-tile accumulation + ragged (partial) last block
    loss = focal_loss(logits, targets, tile_n=16)
    jax.block_until_ready(loss)
    ref = focal_loss_ref(logits, targets)
    assert jnp.allclose(loss, ref, rtol=1e-5, atol=1e-6), (loss, ref)

    # default tiling + bf16 input path (bf16 max/gather on bf16-native chips,
    # f32 LSE chain) — numerically identical to the f32 reference
    loss_bf16 = focal_loss(logits.astype(jnp.bfloat16), targets)
    jax.block_until_ready(loss_bf16)
    ref_bf16 = focal_loss_ref(logits.astype(jnp.bfloat16), targets)
    assert jnp.allclose(loss_bf16, ref_bf16, rtol=1e-5, atol=1e-5), (loss_bf16, ref_bf16)

    # optional per-class alpha weighting
    alpha = jnp.linspace(0.5, 1.5, C, dtype=jnp.float32)
    loss_a = focal_loss(logits, targets, alpha=alpha, tile_n=16)
    jax.block_until_ready(loss_a)
    ref_a = focal_loss_ref(logits, targets, alpha=alpha)
    assert jnp.allclose(loss_a, ref_a, rtol=1e-5, atol=1e-6), (loss_a, ref_a)

    print("KERNEL_OK")
</pallas_src>

<mosaic_0001>
module attributes {stable_mosaic.version = 11 : i64} {
  func.func @_focal_loss_kernel(%arg0: i32, %arg1: i32, %arg2: memref<16x16xf32, #tpu.memory_space<vmem>>, %arg3: memref<16x1xi32, #tpu.memory_space<vmem>>, %arg4: memref<8x128xf32, #tpu.memory_space<vmem>>) attributes {dimension_semantics = [#tpu.dimension_semantics<parallel>, #tpu.dimension_semantics<arbitrary>], iteration_bounds = array<i64: 1, 3>, scalar_prefetch = 0 : i64, scratch_operands = 0 : i64, tpu.core_type = #tpu.core_type<tc>, window_params = [{transform_indices = @transform_0, window_bounds = array<i64: 16, 16>}, {transform_indices = @transform_1, window_bounds = array<i64: 16, 1>}, {transform_indices = @transform_2, window_bounds = array<i64: 8, 128>}]} {
    %c0_i32 = arith.constant 0 : i32
    %0 = arith.cmpi eq, %arg1, %c0_i32 : i32
    %1 = arith.extui %0 : i1 to i32
    %c0_i32_0 = arith.constant 0 : i32
    %2 = arith.cmpi ne, %1, %c0_i32_0 : i32
    scf.if %2 {
      %cst_16 = arith.constant 0.000000e+00 : f32
      %50 = vector.broadcast %cst_16 : f32 to vector<8x128xf32>
      %c0_17 = arith.constant 0 : index
      %c0_18 = arith.constant 0 : index
      %51 = vector.load %arg4[%c0_17, %c0_18] : memref<8x128xf32, #tpu.memory_space<vmem>>, vector<8x128xf32>
      tpu.vector_store %arg4[%c0_17, %c0_18], %50 {strides = array<i32>} : memref<8x128xf32, #tpu.memory_space<vmem>>, vector<8x128xf32>,
    } else {
    }
    %c0 = arith.constant 0 : index
    %c0_1 = arith.constant 0 : index
    %3 = vector.load %arg2[%c0, %c0_1] : memref<16x16xf32, #tpu.memory_space<vmem>>, vector<16x16xf32>
    %c0_2 = arith.constant 0 : index
    %c0_3 = arith.constant 0 : index
    %4 = vector.load %arg3[%c0_2, %c0_3] : memref<16x1xi32, #tpu.memory_space<vmem>>, vector<16x1xi32>
    %5 = tpu.iota {dimensions = array<i32: 1>} : vector<1x16xi32>
    %6 = vector.broadcast %5 : vector<1x16xi32> to vector<16x16xi32>
    %7 = vector.broadcast %4 : vector<16x1xi32> to vector<16x16xi32>
    %8 = arith.cmpi eq, %6, %7 : vector<16x16xi32>
    %cst = arith.constant dense<0xFF800000> : vector<16xf32>
    %9 = vector.multi_reduction <maximumf>, %3, %cst [1] : vector<16x16xf32> to vector<16xf32>
    %10 = vector.shape_cast %9 : vector<16xf32> to vector<16x1xf32>
    %cst_4 = arith.constant 0.000000e+00 : f32
    %11 = vector.broadcast %cst_4 : f32 to vector<16x16xf32>
    %12 = arith.select %8, %3, %11 : vector<16x16xi1>, vector<16x16xf32>
    %cst_5 = arith.constant dense<0.000000e+00> : vector<16xf32>
    %13 = vector.multi_reduction <add>, %12, %cst_5 [1] : vector<16x16xf32> to vector<16xf32>
    %14 = vector.shape_cast %13 : vector<16xf32> to vector<16x1xf32>
    %15 = vector.broadcast %10 : vector<16x1xf32> to vector<16x16xf32>
    %16 = arith.subf %3, %15 : vector<16x16xf32>
    %17 = math.exp %16 : vector<16x16xf32>
    %cst_6 = arith.constant dense<0.000000e+00> : vector<16xf32>
    %18 = vector.multi_reduction <add>, %17, %cst_6 [1] : vector<16x16xf32> to vector<16xf32>
    %19 = vector.shape_cast %18 : vector<16xf32> to vector<16x1xf32>
    %20 = math.log %19 : vector<16x1xf32>
    %21 = arith.addf %10, %20 : vector<16x1xf32>
    %22 = arith.subf %21, %14 : vector<16x1xf32>
    %cst_7 = arith.constant 0.000000e+00 : f32
    %23 = vector.broadcast %cst_7 : f32 to vector<16x1xf32>
    %24 = arith.subf %23, %22 : vector<16x1xf32>
    %25 = math.exp %24 : vector<16x1xf32>
    %cst_8 = arith.constant 1.000000e+00 : f32
    %26 = vector.broadcast %cst_8 : f32 to vector<16x1xf32>
    %27 = arith.subf %26, %25 : vector<16x1xf32>
    %cst_9 = arith.constant 0.000000e+00 : f32
    %28 = vector.broadcast %cst_9 : f32 to vector<16x1xf32>
    %29 = arith.maximumf %27, %28 : vector<16x1xf32>
    %30 = arith.mulf %29, %29 : vector<16x1xf32>
    %31 = arith.mulf %30, %22 : vector<16x1xf32>
    %c3_i32 = arith.constant 3 : i32
    %32 = arith.muli %arg0, %c3_i32 : i32
    %33 = arith.addi %32, %arg1 : i32
    %c16_i32 = arith.constant 16 : i32
    %34 = arith.muli %33, %c16_i32 : i32
    %35 = tpu.iota {dimensions = array<i32: 0>} : vector<16x1xi32>
    %36 = vector.broadcast %34 : i32 to vector<16x1xi32>
    %37 = arith.addi %36, %35 : vector<16x1xi32>
    %c40_i32 = arith.constant 40 : i32
    %38 = vector.broadcast %c40_i32 : i32 to vector<16x1xi32>
    %39 = arith.cmpi slt, %37, %38 : vector<16x1xi32>
    %cst_10 = arith.constant 0.000000e+00 : f32
    %40 = vector.broadcast %cst_10 : f32 to vector<16x1xf32>
    %41 = arith.select %39, %31, %40 : vector<16x1xi1>, vector<16x1xf32>
    %c0_11 = arith.constant 0 : index
    %c0_12 = arith.constant 0 : index
    %42 = vector.load %arg4[%c0_11, %c0_12] : memref<8x128xf32, #tpu.memory_space<vmem>>, vector<8x128xf32>
    %43 = vector.shape_cast %41 : vector<16x1xf32> to vector<1x16x1xf32>
    %cst_13 = arith.constant dense<0.000000e+00> : vector<1xf32>
    %44 = vector.multi_reduction <add>, %43, %cst_13 [1, 2] : vector<1x16x1xf32> to vector<1xf32>
    %45 = vector.shape_cast %44 : vector<1xf32> to vector<1x1x1xf32>
    %46 = vector.extract %45[0, 0, 0] : f32 from vector<1x1x1xf32>
    %47 = vector.broadcast %46 : f32 to vector<8x128xf32>
    %48 = arith.addf %42, %47 : vector<8x128xf32>
    %c0_14 = arith.constant 0 : index
    %c0_15 = arith.constant 0 : index
    %49 = vector.load %arg4[%c0_14, %c0_15] : memref<8x128xf32, #tpu.memory_space<vmem>>, vector<8x128xf32>
    tpu.vector_store %arg4[%c0_14, %c0_15], %48 {strides = array<i32>} : memref<8x128xf32, #tpu.memory_space<vmem>>, vector<8x128xf32>,
    return
  }
  func.func @transform_0(%arg0: i32, %arg1: i32) -> (i32, i32) {
    %c3_i32 = arith.constant 3 : i32
    %0 = arith.muli %arg0, %c3_i32 : i32
    %1 = arith.addi %0, %arg1 : i32
    %c2_i32 = arith.constant 2 : i32
    %2 = arith.minsi %1, %c2_i32 : i32
    %c0_i32 = arith.constant 0 : i32
    %c0_i32_0 = arith.constant 0 : i32
    return %2, %c0_i32 : i32, i32
  }
  func.func @transform_1(%arg0: i32, %arg1: i32) -> (i32, i32) {
    %c3_i32 = arith.constant 3 : i32
    %0 = arith.muli %arg0, %c3_i32 : i32
    %1 = arith.addi %0, %arg1 : i32
    %c2_i32 = arith.constant 2 : i32
    %2 = arith.minsi %1, %c2_i32 : i32
    %c0_i32 = arith.constant 0 : i32
    %c0_i32_0 = arith.constant 0 : i32
    return %2, %c0_i32 : i32, i32
  }
  func.func @transform_2(%arg0: i32, %arg1: i32) -> (i32, i32) {
    %c0_i32 = arith.constant 0 : i32
    %c0_i32_0 = arith.constant 0 : i32
    return %arg0, %c0_i32 : i32, i32
  }
}

</mosaic_0001>

<bundles_post_ra>
// kernel: tpu_custom_call.1
= control target key start
LH: loop header
LB: loop body
LE: loop exit
PB: predicated region body
PF: predicated region fallthrough
CT: control target
= control target key end

     0   :  { %7 = vsyncpa [#allocation3], 0  ;;  %s571_s9 = smov 0   ;;  %s573_s10 = smov 0   ;;  %s645_s0 = inlined_call_operand.vmem [shape: f32[40,16], index: 0, kind: input, shape index: {}]   ;;  %s646_s1 = inlined_call_operand.vmem [shape: s32[40,1], index: 1, kind: input, shape index: {}]   ;;  %s647_s2 = inlined_call_operand.hbm [shape: f32[8,128], index: 2, kind: output, shape index: {}]  }
   0x1   :  { %s575_s11 = smov 0  }
   0x2 LB: > { %s436_s12 = sadd.s32 4294967295, %s551_s11   ;;  %s22_s13 = sadd.s32 1, %s547_s10  ;;  %s551_s11 = sphi %s575_s11, %s13_s11   ;;  %s547_s10 = sphi %s573_s10, %s650_s10   ;;  %s543_s9 = sphi %s571_s9, %s649_s9  }
   0x3   : > { %p23_p0 = scmp.ge.s32.totalorder %s22_s13, 3  ;;  %p439_p1 = scmp.ge.s32.totalorder %s551_s11, 1 }
   0x4   : > { %p185_p2 = scmp.lt.s32.totalorder %s551_s11, 4 }
   0x5   : > { %s652_s13 = smov (%p23_p0, %s22_s13), 0 }
   0x6   : > { %p186_p3 = pnand %p439_p1, %p185_p2 }
   0x7   : > { %p225_p4 = scmp.lt.s32.totalorder (!%p186_p3), %s543_s9, 2  ;;  %p444_p6 = scmp.ne.s32.totalorder (!%p186_p3), %s543_s9, 0 }
   0x8   : > { %189 = sbr.rel (%p186_p3) target bundleno = 595 (0x253), region = 28 }
   0xf   : > { %s226_s14 = scalar_select %p225_p4, %s543_s9, 2 }
  0x10   : > { %270 = sbr.rel (%p444_p6) target bundleno = 23 (0x17), region = 32  ;;  %v553_v0 = vmov (!%p444_p6), 0.0  }
  0x11   : > { %s440_s15 = sshll.u32 %s226_s14, 1  ;;  %271 = vst [vmem:[#allocation2] sm:$0xff] (!%p444_p6), %v553_v0 }
  0x12   : > { %p232_p5 = scmp.lt.s32.totalorder %s440_s15, 4 }
  0x14   : > { %s654_s15 = smov (!%p232_p5, %s440_s15), 4 }
  0x15   : > { %s441_s16 = sshll.u32 %s654_s15, 3 }
  0x16   : > { %s235_s19 = scalar_lea.vmem %s645_s0, %s441_s16  ;;  %s257_s22 = scalar_lea.vmem %s646_s1, %s441_s16 }
  0x17 PF: > { %v272_v1 = vld [vmem:[%s235_s19] sm:$0xff]  ;;  %vm286_vm0 = vcmask 130048   ;;  %v273_v2 = vld [vmem:[%s235_s19 + $0x8] sm:$0xff]  ;;  %v554_v5 = vmov 0   ;;  %v276_v12 = vlaneseq  ;;  %s445_s23 = sshll.u32 %s543_s9, 4  ;;  %vm349_vm5 = vcmask 7168  }
  0x18   : > { %v274_v3 = vld [vmem:[%s257_s22] sm:$0xff]  ;;  %v287_v4 = vsel %vm286_vm0, %v272_v1, -inf  ;;  %485 = vset.pattern.permute.xlu1 %v554_v5  ;;  %486 = vset.pattern.permute.xlu0 %v554_v5  ;;  %v290_v6 = vsel %vm286_vm0, %v273_v2, -inf  ;;  %v275_v7 = vld [vmem:[%s257_s22 + $0x8] sm:$0xff]  ;;  %v341_v45 = vstv %s445_s23  ;;  %s555_s24 = smov [#allocation2]   ;;  %p610_p7 = scmp.eq.s32.totalorder %s436_s12, 2 }
  0x19   : > { %288 = vmax.xlane.f32.xlu0 %v287_v4  ;;  %279 = vperm.xlu1 %485, %v274_v3   ;;  %v277_v16 = vand.u32 127, %v276_v12  ;;  %v339_v43 = vshrl.u32 %v276_v12, 7  ;;  %v348_v5 = vld [vmem:[#allocation2] sm:$0xff]  ;;  %s374_s25 = sshll.u32 %s555_s24, 4  ;;  %s375_s25 = int_to_ptr.vmem [resolvable:$true] %s374_s25 }
  0x1a   : > { %s499_s28 = scalar_lea.vmem %s375_s25, 128  ;;  %p506_p11 = scmp.lt.s32.totalorder %s375_s25, %s375_s25 }
  0x1b   : > { %v340_v46 = vadd.s32 8, %v339_v43  ;;  %v342_v49 = vadd.s32 %v341_v45, %v339_v43  ;;  %p500_p8 = scmp.ne.s32.totalorder %s375_s25, %s499_s28  ;;  %p507_p12 = scmp.lt.s32.totalorder %s499_s28, %s499_s28 }
  0x1d   : > { %291 = vmax.xlane.f32.xlu0 %v290_v6  ;;  %282 = vperm.xlu1 %485, %v275_v7   ;;  %v343_v52 = vadd.s32 %v341_v45, %v340_v46  ;;  %vm344_vm3 = vcmp.lt.s32.totalorder %v342_v49, 40  ;;  %p501_p9 = pnand %p500_p8, %p610_p7  ;;  %p508_p13 = por %p507_p12, %p506_p11 }
  0x1f   : > { %vm345_vm4 = vcmp.lt.s32.totalorder %v343_v52, 40  ;;  %p502_p10 = pneg %p501_p9 }
  0x21   : > { %p509_p0 = pnand %p508_p13, %p502_p10 }
  0x98   : > { %v280_v15 = vpop.permute.xlu1 %279 }
  0x99   : > { %vm284_vm1 = vcmp.eq.s32.totalorder %v277_v16, %v280_v15 }
  0x9a   : > { %v293_v19 = vsel %vm284_vm1, %v272_v1, 0.0 }
  0x9b   : > { %v295_v21 = vsel %vm286_vm0, %v293_v19, 0.0 }
  0x9c   : > { %v283_v17 = vpop.permute.xlu1 %282 }
  0x9d   : > { %vm285_vm2 = vcmp.eq.s32.totalorder %v277_v16, %v283_v17 }
  0x9e   : > { %v294_v23 = vsel %vm285_vm2, %v273_v2, 0.0 }
  0x9f   : > { %v298_v25 = vsel %vm286_vm0, %v294_v23, 0.0 }
  0xa6   : > { %v289_v8 = vpop.xlane.xlu0 %288 }
  0xa7   : > { %v301_v9 = vsub.f32 %v272_v1, %v289_v8 }
  0xa9   : > { %v303_v10 = vmul.f32 1.442695, %v301_v9 }
  0xaa   : > { %v292_v11 = vpop.xlane.xlu0 %291 }
  0xab   : > { %487 = vpow2.f32 %v303_v10  ;;  %v302_v13 = vsub.f32 %v273_v2, %v292_v11 }
  0xad   : > { %v305_v14 = vmul.f32 1.442695, %v302_v13 }
  0xaf   : > { %489 = vpow2.f32 %v305_v14 }
  0xb5   : > { %v488_v18 = vpop.eup %487 }
  0xb6   : > { %v307_v20 = vsel %vm286_vm0, %v488_v18, 0.0 }
  0xb7   : > { %308 = vadd.xlane.f32.xlu0 %v307_v20 }
  0xb9   : > { %v490_v22 = vpop.eup %489 }
  0xba   : > { %v310_v24 = vsel %vm286_vm0, %v490_v22, 0.0 }
  0xbb   : > { %311 = vadd.xlane.f32.xlu1 %v310_v24  ;;  %296 = vadd.xlane.f32.xlu0 %v295_v21 }
  0xbf   : > { %299 = vadd.xlane.f32.xlu0 %v298_v25 }
 0x144   : > { %v309_v26 = vpop.xlane.xlu0 %308 }
 0x145   : > { %491 = vlog2.f32 %v309_v26 }
 0x148   : > { %v312_v27 = vpop.xlane.xlu1 %311  ;;  %v297_v30 = vpop.xlane.xlu0 %296 }
 0x149   : > { %493 = vlog2.f32 %v312_v27 }
 0x14c   : > { %v300_v37 = vpop.xlane.xlu0 %299 }
 0x14f   : > { %v492_v28 = vpop.eup %491 }
 0x150   : > { %v314_v29 = vmul.f32 0.6931472, %v492_v28 }
 0x152   : > { %v317_v31 = vadd.f32 %v314_v29, %v289_v8 }
 0x153   : > { %v494_v32 = vpop.eup %493 }
 0x154   : > { %v316_v33 = vmul.f32 0.6931472, %v494_v32  ;;  %v319_v34 = vsub.f32 %v317_v31, %v297_v30 }
 0x156   : > { %v321_v35 = vsub.f32 0.0, %v319_v34  ;;  %v318_v36 = vadd.f32 %v316_v33, %v292_v11 }
 0x158   : > { %v323_v38 = vmul.f32 1.442695, %v321_v35  ;;  %v320_v39 = vsub.f32 %v318_v36, %v300_v37 }
 0x15a   : > { %495 = vpow2.f32 %v323_v38  ;;  %v322_v40 = vsub.f32 0.0, %v320_v39 }
 0x15c   : > { %v325_v41 = vmul.f32 1.442695, %v322_v40 }
 0x15e   : > { %497 = vpow2.f32 %v325_v41 }
 0x164   : > { %v496_v42 = vpop.eup %495 }
 0x165   : > { %v327_v44 = vsub.f32 1.0, %v496_v42 }
 0x167   : > { %v329_v47 = vmax.f32 %v327_v44, 0.0 }
 0x168   : > { %v498_v48 = vpop.eup %497 }
 0x169   : > { %v331_v50 = vmul.f32 %v329_v47, %v329_v47  ;;  %v328_v51 = vsub.f32 1.0, %v498_v48 }
 0x16b   : > { %v333_v53 = vmul.f32 %v331_v50, %v319_v34  ;;  %v330_v54 = vmax.f32 %v328_v51, 0.0 }
 0x16d   : > { %v332_v55 = vmul.f32 %v330_v54, %v330_v54  ;;  %v346_v57 = vsel %vm344_vm3, %v333_v53, 0.0 }
 0x16e   : > { %v350_v59 = vsel %vm349_vm5, %v346_v57, 0.0 }
 0x16f   : > { %v334_v56 = vmul.f32 %v332_v55, %v320_v39 }
 0x171   : > { %v347_v58 = vsel %vm345_vm4, %v334_v56, 0.0 }
 0x172   : > { %v351_v60 = vsel %vm349_vm5, %v347_v58, 0.0 }
 0x173   : > { %v352_v61 = vadd.f32 %v351_v60, %v350_v59 }
 0x175   : > { %353 = vadd.xlane.f32.xlu0 %v352_v61 }
 0x202   : > { %v354_v62 = vpop.xlane.xlu0 %353 }
 0x203   : > { %v355_v63 = vrot.slane %v354_v62, 4 }
 0x205   : > { %v356_v0 = vadd.f32 %v355_v63, %v354_v62 }
 0x207   : > { %v357_v1 = vrot.slane %v356_v0, 2 }
 0x209   : > { %v358_v2 = vadd.f32 %v357_v1, %v356_v0 }
 0x20b   : > { %v359_v3 = vrot.slane %v358_v2, 1 }
 0x20d   : > { %v360_v4 = vadd.f32 %v359_v3, %v358_v2 }
 0x20f   : > { %450 = vpush %v360_v4 }
 0x240   : > { %s451_s26 = spop %450 }
 0x241   : > { %v362_v6 = vstv %s451_s26 }
 0x242   : > { %v363_v7 = vadd.f32 %v362_v6, %v348_v5 }
 0x244   : > { %364 = vst [vmem:[#allocation2] sm:$0xff] %v363_v7 }
 0x245   : > { %512 = shalt.err (!%p509_p0)
}
 0x246   : > { %s513_s3 = scalar_lea.hbm %s647_s2, 128 }
 0x247   : > { %p514_p1 = scmp.ne.s32.totalorder %s647_s2, %s513_s3  ;;  %p519_p4 = scmp.lt.u32.totalorder %s513_s3, %s647_s2 }
 0x249   : > { %p515_p2 = pnand %p514_p1, %p610_p7 }
 0x24b   : > { %p516_p3 = pneg %p515_p2 }
 0x24d   : > { %p521_p5 = pnand %p519_p4, %p516_p3 }
 0x24f   : > { %524 = shalt.err (!%p521_p5)
}
 0x250   : > { %453 = dma.vmem_to_hbm [thread:$0]  (%p610_p7), %s375_s25, 128, %s647_s2, [#allocation3]  }
 0x251   : > { %538 = dma.done.wait (%p610_p7), [#allocation3], 128  }
 0x252   : > { %540 = vsyncadd (%p610_p7), [#allocation3], 4294967168 }
 0x253 PF: > { %s13_s11 = sadd.s32 1, %s551_s11   ;;  %s649_s9 = smov %s547_s10 }
 0x254   : > { %p10_p6 = scmp.ge.s32.totalorder %s13_s11, 5   ;;  %s650_s10 = smov %s652_s13 }
 0x256   :  { %12 = sbr.rel (!%p10_p6) target bundleno = 2 (0x2), region = 63 }
 0x25d   :  { %387 = vsyncpa [#allocation3], 1 }
 0x25e   :  { %389 = vsyncpa [#allocation3 + $0x1], 1 }

</bundles_post_ra>
